<compile_context>
chip_gen: v5e
topology: v5e:2x2
jax: 0.10.0
libtpu: 0.0.40
codegen_flags: <defaults>
</compile_context>

<pallas_src>
import jax
import jax.numpy as jnp
from jax.experimental import pallas as pl
from jax.experimental.pallas import tpu as pltpu

N_HIDDEN = 256
N_OUT = 784  # 28 * 28


def decoder_kernel(x_ref, w1_ref, b1_ref, w2_ref, b2_ref, o_ref, h_ref):
    # Layer 1: bf16 MXU matmul (K = enc), f32 accumulate; f32 bias + ReLU (VPU).
    h = jnp.dot(x_ref[...], w1_ref[...], preferred_element_type=jnp.float32)
    h_ref[...] = jnp.maximum(h + b1_ref[...], 0.0).astype(jnp.bfloat16)

    # Layer 2: bf16 MXU matmul (K = 256, N = 784); f32 epilogue.
    y = jnp.dot(h_ref[...], w2_ref[...], preferred_element_type=jnp.float32)
    y = y + b2_ref[...]
    # sigmoid(y) == 0.5 * (tanh(y/2) + 1): single EUP transcendental.
    o_ref[...] = (0.5 * (jnp.tanh(0.5 * y) + 1.0)).astype(o_ref.dtype)


def _round_up(v, m):
    return ((v + m - 1) // m) * m


def _choose_tb(batch, block_b):
    """Batch tile: multiple of 8, capped at block_b; >= 4 grid steps when the
    batch is large enough (v7x megacore + per-step DMA pipelining)."""
    b8 = _round_up(batch, 8)
    if b8 >= 512:
        tb = max(256, _round_up(-(-b8 // 4), 8))
    else:
        tb = b8
    return min(tb, block_b)


def decoder_forward(x, w1, b1, w2, b2, *, block_b=1024, out_dtype=jnp.float32):
    """x: (B, enc_dim) float32 -> (B, 1, 28, 28) out_dtype.

    w1: (enc, 256), b1: (1, 256), w2: (256, 784), b2: (1, 784).
    Weights may already be bf16 (preferred: cast them once at init)."""
    B, enc = x.shape

    tb = _choose_tb(B, block_b)
    b_pad = _round_up(B, tb)

    x_p = x if b_pad == B else jnp.pad(x, ((0, b_pad - B), (0, 0)))
    x_bf = x_p.astype(jnp.bfloat16)
    w1_bf = w1 if w1.dtype == jnp.bfloat16 else w1.astype(jnp.bfloat16)
    w2_bf = w2 if w2.dtype == jnp.bfloat16 else w2.astype(jnp.bfloat16)

    out_bytes = jnp.dtype(out_dtype).itemsize
    cost = pl.CostEstimate(
        flops=2 * b_pad * (enc * N_HIDDEN + N_HIDDEN * N_OUT),
        transcendentals=b_pad * N_OUT,  # one tanh per output element
        bytes_accessed=(x_bf.size * 2 + w1_bf.size * 2 + b1.size * 4
                        + w2_bf.size * 2 + b2.size * 4
                        + b_pad * N_OUT * out_bytes),
    )

    out_flat = pl.pallas_call(
        decoder_kernel,
        out_shape=jax.ShapeDtypeStruct((b_pad, N_OUT), out_dtype),
        grid=(b_pad // tb,),
        in_specs=[
            pl.BlockSpec((tb, enc), lambda i: (i, 0)),             # x tile
            pl.BlockSpec((enc, N_HIDDEN), lambda i: (0, 0)),       # w1 (resident)
            pl.BlockSpec((1, N_HIDDEN), lambda i: (0, 0)),         # b1 (resident)
            pl.BlockSpec((N_HIDDEN, N_OUT), lambda i: (0, 0)),     # w2 (resident)
            pl.BlockSpec((1, N_OUT), lambda i: (0, 0)),            # b2 (resident)
        ],
        out_specs=pl.BlockSpec((tb, N_OUT), lambda i: (i, 0)),
        scratch_shapes=[pltpu.VMEM((tb, N_HIDDEN), jnp.bfloat16)],  # hidden h
        compiler_params=pltpu.CompilerParams(
            dimension_semantics=("parallel",)),
        cost_estimate=cost,
    )(x_bf, w1_bf, b1, w2_bf, b2)

    # Drop batch padding only (no column padding anymore), then
    # nn.Unflatten(dim=1, (1, 28, 28)) — pure reshape, NCHW output.
    return out_flat[:B].reshape(B, 1, 28, 28)


def init_params(key, encoding_dim):
    """Deterministic init mimicking nn.Linear's uniform(-1/sqrt(fan_in), +)."""
    k1, k2, k3, k4 = jax.random.split(key, 4)
    bound1 = 1.0 / jnp.sqrt(encoding_dim)
    bound2 = 1.0 / jnp.sqrt(256.0)
    # Stored transposed vs. PyTorch (in, out) so the kernel does x @ W directly.
    w1 = jax.random.uniform(k1, (encoding_dim, N_HIDDEN), jnp.float32, -bound1, bound1)
    b1 = jax.random.uniform(k2, (1, N_HIDDEN), jnp.float32, -bound1, bound1)
    w2 = jax.random.uniform(k3, (N_HIDDEN, N_OUT), jnp.float32, -bound2, bound2)
    b2 = jax.random.uniform(k4, (1, N_OUT), jnp.float32, -bound2, bound2)
    return w1, b1, w2, b2


if __name__ == "__main__":
    encoding_dim = 32
    batch = 8

    key = jax.random.PRNGKey(0)
    kx, kp = jax.random.split(key)
    x = jax.random.normal(kx, (batch, encoding_dim), jnp.float32)
    w1, b1, w2, b2 = init_params(kp, encoding_dim)

    # Hoisted one-time weight cast (out of the per-call path).
    w1_bf = w1.astype(jnp.bfloat16)
    w2_bf = w2.astype(jnp.bfloat16)

    out = decoder_forward(x, w1_bf, b1, w2_bf, b2)
    out = jax.block_until_ready(out)

    # Sanity check vs. plain-JAX f32 reference (bf16 matmul inputs -> loose tol).
    ref = jax.nn.sigmoid(
        jnp.maximum(x @ w1 + b1, 0.0) @ w2 + b2
    ).reshape(batch, 1, 28, 28)
    assert out.shape == (batch, 1, 28, 28)
    assert out.dtype == jnp.float32
    assert jnp.allclose(out, ref, atol=2e-2, rtol=2e-2), (
        float(jnp.max(jnp.abs(out - ref))))

    print("KERNEL_OK")
</pallas_src>

<mosaic_0001>
module attributes {stable_mosaic.version = 11 : i64} {
  func.func @decoder_kernel(%arg0: i32, %arg1: memref<8x32xbf16, #tpu.memory_space<vmem>>, %arg2: memref<32x256xbf16, #tpu.memory_space<vmem>>, %arg3: memref<1x256xf32, #tpu.memory_space<vmem>>, %arg4: memref<256x784xbf16, #tpu.memory_space<vmem>>, %arg5: memref<1x784xf32, #tpu.memory_space<vmem>>, %arg6: memref<8x784xf32, #tpu.memory_space<vmem>>, %arg7: memref<8x256xbf16, #tpu.memory_space<vmem>>) attributes {dimension_semantics = [#tpu.dimension_semantics<parallel>], iteration_bounds = array<i64: 1>, scalar_prefetch = 0 : i64, scratch_operands = 1 : i64, tpu.core_type = #tpu.core_type<tc>, window_params = [{transform_indices = @transform_0, window_bounds = array<i64: 8, 32>}, {pipeline_mode = #tpu.pipeline_mode<synchronous>, transform_indices = @transform_1, window_bounds = array<i64: 32, 256>}, {pipeline_mode = #tpu.pipeline_mode<synchronous>, transform_indices = @transform_2, window_bounds = array<i64: 1, 256>}, {pipeline_mode = #tpu.pipeline_mode<synchronous>, transform_indices = @transform_3, window_bounds = array<i64: 256, 784>}, {pipeline_mode = #tpu.pipeline_mode<synchronous>, transform_indices = @transform_4, window_bounds = array<i64: 1, 784>}, {transform_indices = @transform_5, window_bounds = array<i64: 8, 784>}]} {
    %c0 = arith.constant 0 : index
    %c0_0 = arith.constant 0 : index
    %0 = vector.load %arg1[%c0, %c0_0] : memref<8x32xbf16, #tpu.memory_space<vmem>>, vector<8x32xbf16>
    %c0_1 = arith.constant 0 : index
    %c0_2 = arith.constant 0 : index
    %1 = vector.load %arg2[%c0_1, %c0_2] : memref<32x256xbf16, #tpu.memory_space<vmem>>, vector<32x256xbf16>
    %cst = arith.constant dense<0.000000e+00> : vector<8x256xf32>
    %2 = tpu.matmul %0, %1, %cst {dimension_numbers = #tpu.dot_dimension_numbers<[1], [0], [0], [1], [0, 0, 1, 1], [], []>} : vector<8x32xbf16>, vector<32x256xbf16>, vector<8x256xf32> -> vector<8x256xf32>
    %c0_3 = arith.constant 0 : index
    %c0_4 = arith.constant 0 : index
    %3 = vector.load %arg3[%c0_3, %c0_4] : memref<1x256xf32, #tpu.memory_space<vmem>>, vector<1x256xf32>
    %4 = vector.broadcast %3 : vector<1x256xf32> to vector<8x256xf32>
    %5 = arith.addf %2, %4 : vector<8x256xf32>
    %cst_5 = arith.constant 0.000000e+00 : f32
    %6 = vector.broadcast %cst_5 : f32 to vector<8x256xf32>
    %7 = arith.maximumf %5, %6 : vector<8x256xf32>
    %8 = arith.truncf %7 : vector<8x256xf32> to vector<8x256xbf16>
    %c0_6 = arith.constant 0 : index
    %c0_7 = arith.constant 0 : index
    %9 = vector.load %arg7[%c0_6, %c0_7] : memref<8x256xbf16, #tpu.memory_space<vmem>>, vector<8x256xbf16>
    tpu.vector_store %arg7[%c0_6, %c0_7], %8 {strides = array<i32>} : memref<8x256xbf16, #tpu.memory_space<vmem>>, vector<8x256xbf16>,
    %c0_8 = arith.constant 0 : index
    %c0_9 = arith.constant 0 : index
    %10 = vector.load %arg7[%c0_8, %c0_9] : memref<8x256xbf16, #tpu.memory_space<vmem>>, vector<8x256xbf16>
    %c0_10 = arith.constant 0 : index
    %c0_11 = arith.constant 0 : index
    %11 = vector.load %arg4[%c0_10, %c0_11] : memref<256x784xbf16, #tpu.memory_space<vmem>>, vector<256x784xbf16>
    %cst_12 = arith.constant dense<0.000000e+00> : vector<8x784xf32>
    %12 = tpu.matmul %10, %11, %cst_12 {dimension_numbers = #tpu.dot_dimension_numbers<[1], [0], [0], [1], [0, 0, 1, 1], [], []>} : vector<8x256xbf16>, vector<256x784xbf16>, vector<8x784xf32> -> vector<8x784xf32>
    %c0_13 = arith.constant 0 : index
    %c0_14 = arith.constant 0 : index
    %13 = vector.load %arg5[%c0_13, %c0_14] : memref<1x784xf32, #tpu.memory_space<vmem>>, vector<1x784xf32>
    %14 = vector.broadcast %13 : vector<1x784xf32> to vector<8x784xf32>
    %15 = arith.addf %12, %14 : vector<8x784xf32>
    %cst_15 = arith.constant 5.000000e-01 : f32
    %16 = vector.broadcast %cst_15 : f32 to vector<8x784xf32>
    %17 = arith.mulf %16, %15 : vector<8x784xf32>
    %18 = math.tanh %17 : vector<8x784xf32>
    %cst_16 = arith.constant 1.000000e+00 : f32
    %19 = vector.broadcast %cst_16 : f32 to vector<8x784xf32>
    %20 = arith.addf %18, %19 : vector<8x784xf32>
    %cst_17 = arith.constant 5.000000e-01 : f32
    %21 = vector.broadcast %cst_17 : f32 to vector<8x784xf32>
    %22 = arith.mulf %21, %20 : vector<8x784xf32>
    %c0_18 = arith.constant 0 : index
    %c0_19 = arith.constant 0 : index
    %23 = vector.load %arg6[%c0_18, %c0_19] : memref<8x784xf32, #tpu.memory_space<vmem>>, vector<8x784xf32>
    tpu.vector_store %arg6[%c0_18, %c0_19], %22 {strides = array<i32>} : memref<8x784xf32, #tpu.memory_space<vmem>>, vector<8x784xf32>,
    return
  }
  func.func @transform_0(%arg0: i32) -> (i32, i32) {
    %c0_i32 = arith.constant 0 : i32
    %c0_i32_0 = arith.constant 0 : i32
    return %arg0, %c0_i32 : i32, i32
  }
  func.func @transform_1(%arg0: i32) -> (i32, i32) {
    %c0_i32 = arith.constant 0 : i32
    %c0_i32_0 = arith.constant 0 : i32
    %c0_i32_1 = arith.constant 0 : i32
    return %c0_i32, %c0_i32_0 : i32, i32
  }
  func.func @transform_2(%arg0: i32) -> (i32, i32) {
    %c0_i32 = arith.constant 0 : i32
    %c0_i32_0 = arith.constant 0 : i32
    %c0_i32_1 = arith.constant 0 : i32
    return %c0_i32, %c0_i32_0 : i32, i32
  }
  func.func @transform_3(%arg0: i32) -> (i32, i32) {
    %c0_i32 = arith.constant 0 : i32
    %c0_i32_0 = arith.constant 0 : i32
    %c0_i32_1 = arith.constant 0 : i32
    return %c0_i32, %c0_i32_0 : i32, i32
  }
  func.func @transform_4(%arg0: i32) -> (i32, i32) {
    %c0_i32 = arith.constant 0 : i32
    %c0_i32_0 = arith.constant 0 : i32
    %c0_i32_1 = arith.constant 0 : i32
    return %c0_i32, %c0_i32_0 : i32, i32
  }
  func.func @transform_5(%arg0: i32) -> (i32, i32) {
    %c0_i32 = arith.constant 0 : i32
    %c0_i32_0 = arith.constant 0 : i32
    return %arg0, %c0_i32 : i32, i32
  }
}

</mosaic_0001>

<bundles_post_ra>
// kernel: tpu_custom_call.1
= control target key start
LH: loop header
LB: loop body
LE: loop exit
PB: predicated region body
PF: predicated region fallthrough
CT: control target
= control target key end

     0   :  { %vm53_vm0 = vcmask 261120   ;;  %s2440_s0 = inlined_call_operand.vmem [shape: bf16[8,32], index: 0, kind: input, shape index: {}]   ;;  %s2441_s1 = inlined_call_operand.vmem [shape: bf16[32,256], index: 1, kind: input, shape index: {}]   ;;  %s2442_s2 = inlined_call_operand.vmem [shape: f32[1,256], index: 2, kind: input, shape index: {}]   ;;  %s2443_s3 = inlined_call_operand.vmem [shape: bf16[256,784], index: 3, kind: input, shape index: {}]   ;;  %s2444_s4 = inlined_call_operand.vmem [shape: f32[1,784], index: 4, kind: input, shape index: {}]   ;;  %s2445_s5 = inlined_call_operand.hbm [shape: f32[8,784], index: 5, kind: output, shape index: {}]  }
   0x1   :  { %v1059_v0 = vld [vmem:[%s2441_s1 + $0x10] sm:$0xf]  ;;  %v1518_v1 = vld [vmem:[%s2441_s1 + $0x14] sm:$0xf0]  ;;  %v1517_v2 = vld [vmem:[%s2441_s1 + $0x14] sm:$0xf] }
   0x2   :  { %v1060_v3 = vor.u32 %v1518_v1, %v1059_v0  ;;  %v1061_v4 = vld [vmem:[%s2441_s1 + $0x18] sm:$0xf0]  ;;  %v1051_v5 = vld [vmem:[%s2441_s1] sm:$0xf]  ;;  %v1516_v6 = vld [vmem:[%s2441_s1 + $0x4] sm:$0xf0] }
   0x3   :  { %v1064_v7 = vor.u32 %v1517_v2, %v1061_v4  ;;  %v1515_v8 = vld [vmem:[%s2441_s1 + $0x4] sm:$0xf]  ;;  %v1053_v9 = vld [vmem:[%s2441_s1 + $0x8] sm:$0xf0]  ;;  %v1052_v10 = vor.u32 %v1516_v6, %v1051_v5  ;;  %v1265_v11 = vld [vmem:[%s2443_s3 + $0x188] sm:$0xf] }
   0x4   :  { %63 = vmatpush.bf16.msra.mxu0 %v1060_v3  ;;  %v1571_v12 = vld [vmem:[%s2443_s3 + $0x1a0] sm:$0xf0]  ;;  %v1056_v13 = vor.u32 %v1515_v8, %v1053_v9  ;;  %v1489_v15 = vld [vmem:[%s2443_s3 + $0x348] sm:$0xf]  ;;  %v1568_v17 = vld [vmem:[%s2443_s3 + $0x18c] sm:$0xf] }
   0x5   :  { %76 = vmatpush.bf16.msra.mxu1 %v1064_v7  ;;  %v1266_v14 = vor.u32 %v1571_v12, %v1265_v11  ;;  %v1627_v16 = vld [vmem:[%s2443_s3 + $0x360] sm:$0xf0]  ;;  %v22_v18 = vld [vmem:[%s2440_s0] sm:$0xf]  ;;  %v1267_v20 = vld [vmem:[%s2443_s3 + $0x1a4] sm:$0xf0] }
   0x6   :  { %v1490_v19 = vor.u32 %v1627_v16, %v1489_v15  ;;  %v1624_v21 = vld [vmem:[%s2443_s3 + $0x34c] sm:$0xf]  ;;  %v1491_v22 = vld [vmem:[%s2443_s3 + $0x364] sm:$0xf0]  ;;  %v1270_v23 = vor.u32 %v1568_v17, %v1267_v20  ;;  %v1237_v25 = vld [vmem:[%s2443_s3 + $0x150] sm:$0xf] }
   0x7   :  { %815 = vmatpush.bf16.msra.mxu2 %v1266_v14  ;;  %v1494_v24 = vor.u32 %v1624_v21, %v1491_v22  ;;  %v1564_v26 = vld [vmem:[%s2443_s3 + $0x168] sm:$0xf0]  ;;  %v1461_v27 = vld [vmem:[%s2443_s3 + $0x310] sm:$0xf]  ;;  %v1561_v30 = vld [vmem:[%s2443_s3 + $0x154] sm:$0xf] }
   0x8   :  { %64 = vmatpush.bf16.msra.mxu0 %v1052_v10  ;;  %828 = vmatpush.bf16.msra.mxu3 %v1490_v19  ;;  %v1238_v28 = vor.u32 %v1564_v26, %v1237_v25  ;;  %v1620_v29 = vld [vmem:[%s2443_s3 + $0x328] sm:$0xf0]  ;;  %v1239_v31 = vld [vmem:[%s2443_s3 + $0x16c] sm:$0xf0]  ;;  %v1617_v34 = vld [vmem:[%s2443_s3 + $0x314] sm:$0xf] }
   0x9   :  { %77 = vmatpush.bf16.msra.mxu1 %v1056_v13  ;;  %v1462_v32 = vor.u32 %v1620_v29, %v1461_v27  ;;  %v1242_v33 = vor.u32 %v1561_v30, %v1239_v31  ;;  %v1463_v35 = vld [vmem:[%s2443_s3 + $0x32c] sm:$0xf0]  ;;  %v1209_v36 = vld [vmem:[%s2443_s3 + $0x118] sm:$0xf]  ;;  %v1557_v38 = vld [vmem:[%s2443_s3 + $0x130] sm:$0xf0] }
   0xa   :  { %v1466_v37 = vor.u32 %v1617_v34, %v1463_v35  ;;  %v1433_v39 = vld [vmem:[%s2443_s3 + $0x2d8] sm:$0xf]  ;;  %v1613_v40 = vld [vmem:[%s2443_s3 + $0x2f0] sm:$0xf0]  ;;  %v1210_v41 = vor.u32 %v1557_v38, %v1209_v36  ;;  %v1554_v42 = vld [vmem:[%s2443_s3 + $0x11c] sm:$0xf] }
   0xb   :  { %1065 = vmatmul.msk.bf16.vlgmr.msra.gmra.mxu0 %vm53_vm0, %v22_v18  ;;  %816 = vmatpush.bf16.msra.mxu2 %v1238_v28  ;;  %v1211_v43 = vld [vmem:[%s2443_s3 + $0x134] sm:$0xf0]  ;;  %v1610_v44 = vld [vmem:[%s2443_s3 + $0x2dc] sm:$0xf]  ;;  %v1434_v45 = vor.u32 %v1613_v40, %v1433_v39  ;;  %v1181_v47 = vld [vmem:[%s2443_s3 + $0xe0] sm:$0xf] }
   0xc   :  { %841 = vmatpush.bf16.msrb.mxu0 %v1270_v23  ;;  %1066 = vmatmul.msk.bf16.vlgmr.msra.gmra.mxu1 %vm53_vm0, %v22_v18  ;;  %v1435_v46 = vld [vmem:[%s2443_s3 + $0x2f4] sm:$0xf0]  ;;  %v1550_v48 = vld [vmem:[%s2443_s3 + $0xf8] sm:$0xf0]  ;;  %v1214_v49 = vor.u32 %v1554_v42, %v1211_v43  ;;  %v1405_v50 = vld [vmem:[%s2443_s3 + $0x2a0] sm:$0xf] }
   0xd   :  { %854 = vmatpush.bf16.msrb.mxu1 %v1494_v24  ;;  %829 = vmatpush.bf16.msra.mxu3 %v1462_v32  ;;  %v1606_v51 = vld [vmem:[%s2443_s3 + $0x2b8] sm:$0xf0]  ;;  %v1438_v52 = vor.u32 %v1610_v44, %v1435_v46  ;;  %v1547_v53 = vld [vmem:[%s2443_s3 + $0xe4] sm:$0xf]  ;;  %v1183_v54 = vld [vmem:[%s2443_s3 + $0xfc] sm:$0xf0]  ;;  %v1182_v55 = vor.u32 %v1550_v48, %v1181_v47 }
   0xe   :  { %v1603_v56 = vld [vmem:[%s2443_s3 + $0x2a4] sm:$0xf]  ;;  %v1407_v57 = vld [vmem:[%s2443_s3 + $0x2bc] sm:$0xf0]  ;;  %v1406_v58 = vor.u32 %v1606_v51, %v1405_v50  ;;  %v1153_v59 = vld [vmem:[%s2443_s3 + $0xa8] sm:$0xf]  ;;  %v1186_v61 = vor.u32 %v1547_v53, %v1183_v54 }
   0xf   :  { %817 = vmatpush.bf16.msra.mxu2 %v1210_v41  ;;  %v1543_v60 = vld [vmem:[%s2443_s3 + $0xc0] sm:$0xf0]  ;;  %v1377_v62 = vld [vmem:[%s2443_s3 + $0x268] sm:$0xf]  ;;  %v1410_v0 = vor.u32 %v1603_v56, %v1407_v57  ;;  %v1540_v1 = vld [vmem:[%s2443_s3 + $0xac] sm:$0xf] }
  0x10   :  { %842 = vmatpush.bf16.msrb.mxu0 %v1242_v33  ;;  %v1599_v63 = vld [vmem:[%s2443_s3 + $0x280] sm:$0xf0]  ;;  %v1155_v2 = vld [vmem:[%s2443_s3 + $0xc4] sm:$0xf0]  ;;  %v1154_v3 = vor.u32 %v1543_v60, %v1153_v59  ;;  %v1596_v4 = vld [vmem:[%s2443_s3 + $0x26c] sm:$0xf] }
  0x11   :  { %855 = vmatpush.bf16.msrb.mxu1 %v1466_v37  ;;  %830 = vmatpush.bf16.msra.mxu3 %v1434_v45  ;;  %v1379_v5 = vld [vmem:[%s2443_s3 + $0x284] sm:$0xf0]  ;;  %v1378_v6 = vor.u32 %v1599_v63, %v1377_v62  ;;  %v1125_v7 = vld [vmem:[%s2443_s3 + $0x70] sm:$0xf]  ;;  %v1536_v8 = vld [vmem:[%s2443_s3 + $0x88] sm:$0xf0]  ;;  %v1158_v9 = vor.u32 %v1540_v1, %v1155_v2 }
  0x12   :  { %v1349_v10 = vld [vmem:[%s2443_s3 + $0x230] sm:$0xf]  ;;  %v1592_v11 = vld [vmem:[%s2443_s3 + $0x248] sm:$0xf0]  ;;  %v1382_v12 = vor.u32 %v1596_v4, %v1379_v5  ;;  %v1533_v13 = vld [vmem:[%s2443_s3 + $0x74] sm:$0xf]  ;;  %v1126_v15 = vor.u32 %v1536_v8, %v1125_v7 }
  0x13   :  { %818 = vmatpush.bf16.msra.mxu2 %v1182_v55  ;;  %v1127_v14 = vld [vmem:[%s2443_s3 + $0x8c] sm:$0xf0]  ;;  %v1589_v16 = vld [vmem:[%s2443_s3 + $0x234] sm:$0xf]  ;;  %v1350_v18 = vor.u32 %v1592_v11, %v1349_v10  ;;  %v1097_v19 = vld [vmem:[%s2443_s3 + $0x38] sm:$0xf] }
  0x14   :  { %843 = vmatpush.bf16.msrb.mxu0 %v1214_v49  ;;  %v1351_v17 = vld [vmem:[%s2443_s3 + $0x24c] sm:$0xf0]  ;;  %v1529_v20 = vld [vmem:[%s2443_s3 + $0x50] sm:$0xf0]  ;;  %v1130_v21 = vor.u32 %v1533_v13, %v1127_v14  ;;  %v1321_v22 = vld [vmem:[%s2443_s3 + $0x1f8] sm:$0xf] }
  0x15   :  { %856 = vmatpush.bf16.msrb.mxu1 %v1438_v52  ;;  %831 = vmatpush.bf16.msra.mxu3 %v1406_v58  ;;  %v1585_v23 = vld [vmem:[%s2443_s3 + $0x210] sm:$0xf0]  ;;  %v1354_v24 = vor.u32 %v1589_v16, %v1351_v17  ;;  %v1526_v25 = vld [vmem:[%s2443_s3 + $0x3c] sm:$0xf]  ;;  %v1099_v26 = vld [vmem:[%s2443_s3 + $0x54] sm:$0xf0]  ;;  %v1098_v28 = vor.u32 %v1529_v20, %v1097_v19 }
  0x16   :  { %v1582_v27 = vld [vmem:[%s2443_s3 + $0x1fc] sm:$0xf]  ;;  %v1323_v29 = vld [vmem:[%s2443_s3 + $0x214] sm:$0xf0]  ;;  %v1069_v30 = vld [vmem:[%s2443_s3] sm:$0xf]  ;;  %v1322_v32 = vor.u32 %v1585_v23, %v1321_v22  ;;  %v1102_v36 = vor.u32 %v1526_v25, %v1099_v26 }
  0x17   :  { %819 = vmatpush.bf16.msra.mxu2 %v1154_v3  ;;  %v1522_v31 = vld [vmem:[%s2443_s3 + $0x18] sm:$0xf0]  ;;  %v1293_v33 = vld [vmem:[%s2443_s3 + $0x1c0] sm:$0xf]  ;;  %v1519_v35 = vld [vmem:[%s2443_s3 + $0x4] sm:$0xf]  ;;  %v1326_v40 = vor.u32 %v1582_v27, %v1323_v29 }
  0x18   :  { %844 = vmatpush.bf16.msrb.mxu0 %v1186_v61  ;;  %v1578_v34 = vld [vmem:[%s2443_s3 + $0x1d8] sm:$0xf0]  ;;  %v1071_v37 = vld [vmem:[%s2443_s3 + $0x1c] sm:$0xf0]  ;;  %v1273_v38 = vld [vmem:[%s2443_s3 + $0x190] sm:$0xf]  ;;  %v1070_v44 = vor.u32 %v1522_v31, %v1069_v30 }
  0x19   :  { %857 = vmatpush.bf16.msrb.mxu1 %v1410_v0  ;;  %832 = vmatpush.bf16.msra.mxu3 %v1378_v6  ;;  %v1572_v39 = vld [vmem:[%s2443_s3 + $0x1a8] sm:$0xf0]  ;;  %v1575_v41 = vld [vmem:[%s2443_s3 + $0x1c4] sm:$0xf]  ;;  %v1497_v42 = vld [vmem:[%s2443_s3 + $0x350] sm:$0xf]  ;;  %v1294_v48 = vor.u32 %v1578_v34, %v1293_v33  ;;  %v1074_v52 = vor.u32 %v1519_v35, %v1071_v37 }
  0x1a   :  { %v1628_v43 = vld [vmem:[%s2443_s3 + $0x368] sm:$0xf0]  ;;  %v1295_v45 = vld [vmem:[%s2443_s3 + $0x1dc] sm:$0xf0]  ;;  %v1569_v46 = vld [vmem:[%s2443_s3 + $0x194] sm:$0xf]  ;;  %v1274_v49 = vor.u32 %v1572_v39, %v1273_v38 }
  0x1b   :  { %820 = vmatpush.bf16.msra.mxu2 %v1126_v15  ;;  %v1275_v47 = vld [vmem:[%s2443_s3 + $0x1ac] sm:$0xf0]  ;;  %v1625_v50 = vld [vmem:[%s2443_s3 + $0x354] sm:$0xf]  ;;  %v1498_v53 = vor.u32 %v1628_v43, %v1497_v42  ;;  %v1245_v54 = vld [vmem:[%s2443_s3 + $0x158] sm:$0xf]  ;;  %v1298_v56 = vor.u32 %v1575_v41, %v1295_v45 }
  0x1c   :  { %845 = vmatpush.bf16.msrb.mxu0 %v1158_v9  ;;  %v1499_v51 = vld [vmem:[%s2443_s3 + $0x36c] sm:$0xf0]  ;;  %v1565_v55 = vld [vmem:[%s2443_s3 + $0x170] sm:$0xf0]  ;;  %v1278_v57 = vor.u32 %v1569_v46, %v1275_v47  ;;  %v1469_v58 = vld [vmem:[%s2443_s3 + $0x318] sm:$0xf] }
  0x1d   :  { %858 = vmatpush.bf16.msrb.mxu1 %v1382_v12  ;;  %833 = vmatpush.bf16.msra.mxu3 %v1350_v18  ;;  %v1621_v59 = vld [vmem:[%s2443_s3 + $0x330] sm:$0xf0]  ;;  %v1502_v60 = vor.u32 %v1625_v50, %v1499_v51  ;;  %v1562_v61 = vld [vmem:[%s2443_s3 + $0x15c] sm:$0xf]  ;;  %v1247_v62 = vld [vmem:[%s2443_s3 + $0x174] sm:$0xf0]  ;;  %v1246_v63 = vor.u32 %v1565_v55, %v1245_v54 }
  0x1e   :  { %v1618_v0 = vld [vmem:[%s2443_s3 + $0x31c] sm:$0xf]  ;;  %v1471_v1 = vld [vmem:[%s2443_s3 + $0x334] sm:$0xf0]  ;;  %v1470_v2 = vor.u32 %v1621_v59, %v1469_v58  ;;  %v1217_v3 = vld [vmem:[%s2443_s3 + $0x120] sm:$0xf]  ;;  %v1250_v5 = vor.u32 %v1562_v61, %v1247_v62 }
  0x1f   :  { %821 = vmatpush.bf16.msra.mxu2 %v1098_v28  ;;  %v1558_v4 = vld [vmem:[%s2443_s3 + $0x138] sm:$0xf0]  ;;  %v1441_v6 = vld [vmem:[%s2443_s3 + $0x2e0] sm:$0xf]  ;;  %v1474_v8 = vor.u32 %v1618_v0, %v1471_v1  ;;  %v1555_v9 = vld [vmem:[%s2443_s3 + $0x124] sm:$0xf] }
  0x20   :  { %846 = vmatpush.bf16.msrb.mxu0 %v1130_v21  ;;  %v1614_v7 = vld [vmem:[%s2443_s3 + $0x2f8] sm:$0xf0]  ;;  %v1219_v10 = vld [vmem:[%s2443_s3 + $0x13c] sm:$0xf0] }
  0x21   :  { %859 = vmatpush.bf16.msrb.mxu1 %v1354_v24  ;;  %834 = vmatpush.bf16.msra.mxu3 %v1322_v32 }
  0x23   :  { %822 = vmatpush.bf16.msra.mxu2 %v1070_v44 }
  0x24   :  { %847 = vmatpush.bf16.msrb.mxu0 %v1102_v36 }
  0x25   :  { %860 = vmatpush.bf16.msrb.mxu1 %v1326_v40  ;;  %835 = vmatpush.bf16.msra.mxu3 %v1294_v48 }
  0x27   :  { %867 = vmatpush.bf16.msrb.mxu2 %v1274_v49 }
  0x28   :  { %848 = vmatpush.bf16.msrb.mxu0 %v1074_v52 }
  0x29   :  { %880 = vmatpush.bf16.msrb.mxu3 %v1498_v53  ;;  %861 = vmatpush.bf16.msrb.mxu1 %v1298_v56 }
  0x2c   :  { %893 = vmatpush.bf16.msra.mxu0 %v1278_v57 }
  0x2d   :  { %906 = vmatpush.bf16.msra.mxu1 %v1502_v60 }
  0x2e   :  { %10 = vsyncpa [#allocation4], 0  ;;  %868 = vmatpush.bf16.msrb.mxu2 %v1246_v63  ;;  %v1218_v11 = vor.u32 %v1558_v4, %v1217_v3  ;;  %v1611_v12 = vld [vmem:[%s2443_s3 + $0x2e4] sm:$0xf]  ;;  %v1443_v13 = vld [vmem:[%s2443_s3 + $0x2fc] sm:$0xf0]  ;;  %881 = vmatpush.bf16.msrb.mxu3 %v1470_v2  ;;  %v1442_v14 = vor.u32 %v1614_v7, %v1441_v6  ;;  %v1222_v17 = vor.u32 %v1555_v9, %v1219_v10 }
  0x2f   :  { %v1189_v15 = vld [vmem:[%s2443_s3 + $0xe8] sm:$0xf]  ;;  %v1551_v16 = vld [vmem:[%s2443_s3 + $0x100] sm:$0xf0]  ;;  %v1446_v20 = vor.u32 %v1611_v12, %v1443_v13  ;;  %v1548_v21 = vld [vmem:[%s2443_s3 + $0xec] sm:$0xf] }
  0x30   :  { %894 = vmatpush.bf16.msra.mxu0 %v1250_v5  ;;  %v1413_v18 = vld [vmem:[%s2443_s3 + $0x2a8] sm:$0xf]  ;;  %v1607_v19 = vld [vmem:[%s2443_s3 + $0x2c0] sm:$0xf0]  ;;  %v1190_v23 = vor.u32 %v1551_v16, %v1189_v15  ;;  %v1604_v24 = vld [vmem:[%s2443_s3 + $0x2ac] sm:$0xf] }
  0x31   :  { %907 = vmatpush.bf16.msra.mxu1 %v1474_v8  ;;  %v1191_v22 = vld [vmem:[%s2443_s3 + $0x104] sm:$0xf0]  ;;  %v1414_v26 = vor.u32 %v1607_v19, %v1413_v18  ;;  %v1161_v27 = vld [vmem:[%s2443_s3 + $0xb0] sm:$0xf]  ;;  %v1544_v28 = vld [vmem:[%s2443_s3 + $0xc8] sm:$0xf0] }
  0x32   :  { %869 = vmatpush.bf16.msrb.mxu2 %v1218_v11  ;;  %v1415_v25 = vld [vmem:[%s2443_s3 + $0x2c4] sm:$0xf0]  ;;  %882 = vmatpush.bf16.msrb.mxu3 %v1442_v14  ;;  %v1194_v29 = vor.u32 %v1548_v21, %v1191_v22  ;;  %v1385_v30 = vld [vmem:[%s2443_s3 + $0x270] sm:$0xf]  ;;  %v1600_v31 = vld [vmem:[%s2443_s3 + $0x288] sm:$0xf0]  ;;  %v1162_v35 = vor.u32 %v1544_v28, %v1161_v27 }
  0x33   :  { %v1418_v32 = vor.u32 %v1604_v24, %v1415_v25  ;;  %v1541_v33 = vld [vmem:[%s2443_s3 + $0xb4] sm:$0xf]  ;;  %v1163_v34 = vld [vmem:[%s2443_s3 + $0xcc] sm:$0xf0]  ;;  %v1386_v38 = vor.u32 %v1600_v31, %v1385_v30  ;;  %v1133_v41 = vld [vmem:[%s2443_s3 + $0x78] sm:$0xf] }
  0x34   :  { %895 = vmatpush.bf16.msra.mxu0 %v1222_v17  ;;  %v1597_v36 = vld [vmem:[%s2443_s3 + $0x274] sm:$0xf]  ;;  %v1387_v37 = vld [vmem:[%s2443_s3 + $0x28c] sm:$0xf0]  ;;  %v1166_v39 = vor.u32 %v1541_v33, %v1163_v34  ;;  %v1357_v44 = vld [vmem:[%s2443_s3 + $0x238] sm:$0xf] }
  0x35   :  { %908 = vmatpush.bf16.msra.mxu1 %v1446_v20  ;;  %v1390_v40 = vor.u32 %v1597_v36, %v1387_v37  ;;  %v1537_v42 = vld [vmem:[%s2443_s3 + $0x90] sm:$0xf0]  ;;  %v1534_v46 = vld [vmem:[%s2443_s3 + $0x7c] sm:$0xf]  ;;  %v1135_v48 = vld [vmem:[%s2443_s3 + $0x94] sm:$0xf0] }
  0x36   :  { %870 = vmatpush.bf16.msrb.mxu2 %v1190_v23  ;;  %883 = vmatpush.bf16.msrb.mxu3 %v1414_v26  ;;  %v1134_v43 = vor.u32 %v1537_v42, %v1133_v41  ;;  %v1593_v45 = vld [vmem:[%s2443_s3 + $0x250] sm:$0xf0]  ;;  %v1590_v49 = vld [vmem:[%s2443_s3 + $0x23c] sm:$0xf]  ;;  %v1359_v50 = vld [vmem:[%s2443_s3 + $0x254] sm:$0xf0]  ;;  %v1138_v51 = vor.u32 %v1534_v46, %v1135_v48 }
  0x37   :  { %v1358_v47 = vor.u32 %v1593_v45, %v1357_v44  ;;  %v1362_v52 = vor.u32 %v1590_v49, %v1359_v50  ;;  %v1105_v53 = vld [vmem:[%s2443_s3 + $0x40] sm:$0xf]  ;;  %v1530_v54 = vld [vmem:[%s2443_s3 + $0x58] sm:$0xf0]  ;;  %v1527_v58 = vld [vmem:[%s2443_s3 + $0x44] sm:$0xf] }
  0x38   :  { %896 = vmatpush.bf16.msra.mxu0 %v1194_v29  ;;  %v1329_v55 = vld [vmem:[%s2443_s3 + $0x200] sm:$0xf]  ;;  %v1106_v56 = vor.u32 %v1530_v54, %v1105_v53  ;;  %v1586_v57 = vld [vmem:[%s2443_s3 + $0x218] sm:$0xf0]  ;;  %v1583_v62 = vld [vmem:[%s2443_s3 + $0x204] sm:$0xf] }
  0x39   :  { %909 = vmatpush.bf16.msra.mxu1 %v1418_v32  ;;  %v1107_v59 = vld [vmem:[%s2443_s3 + $0x5c] sm:$0xf0]  ;;  %v1330_v60 = vor.u32 %v1586_v57, %v1329_v55  ;;  %v1077_v1 = vld [vmem:[%s2443_s3 + $0x8] sm:$0xf]  ;;  %v1523_v2 = vld [vmem:[%s2443_s3 + $0x20] sm:$0xf0] }
  0x3a   :  { %871 = vmatpush.bf16.msrb.mxu2 %v1162_v35  ;;  %884 = vmatpush.bf16.msrb.mxu3 %v1386_v38  ;;  %v1110_v61 = vor.u32 %v1527_v58, %v1107_v59  ;;  %v1331_v63 = vld [vmem:[%s2443_s3 + $0x21c] sm:$0xf0]  ;;  %v1301_v3 = vld [vmem:[%s2443_s3 + $0x1c8] sm:$0xf]  ;;  %v1078_v4 = vor.u32 %v1523_v2, %v1077_v1  ;;  %v1579_v5 = vld [vmem:[%s2443_s3 + $0x1e0] sm:$0xf0] }
  0x3b   :  { %v1334_v0 = vor.u32 %v1583_v62, %v1331_v63  ;;  %v1302_v6 = vor.u32 %v1579_v5, %v1301_v3  ;;  %v1520_v7 = vld [vmem:[%s2443_s3 + $0xc] sm:$0xf]  ;;  %v1079_v8 = vld [vmem:[%s2443_s3 + $0x24] sm:$0xf0]  ;;  %v27_v13 = vld [vmem:[%s2442_s2] sm:$0x3] }
  0x3c   :  { %897 = vmatpush.bf16.msra.mxu0 %v1166_v39  ;;  %v1576_v9 = vld [vmem:[%s2443_s3 + $0x1cc] sm:$0xf]  ;;  %v1082_v10 = vor.u32 %v1520_v7, %v1079_v8  ;;  %v1303_v11 = vld [vmem:[%s2443_s3 + $0x1e4] sm:$0xf0]  ;;  %v29_v14 = vperm.slane %v27_v13, 0  ;;  %v30_v15 = vperm.slane %v27_v13, 1 }
  0x3d   :  { %910 = vmatpush.bf16.msra.mxu1 %v1390_v40  ;;  %v1306_v12 = vor.u32 %v1576_v9, %v1303_v11  ;;  %v1281_v23 = vld [vmem:[%s2443_s3 + $0x198] sm:$0xf]  ;;  %v1573_v24 = vld [vmem:[%s2443_s3 + $0x1b0] sm:$0xf0]  ;;  %v1570_v27 = vld [vmem:[%s2443_s3 + $0x19c] sm:$0xf] }
  0x3e   :  { %872 = vmatpush.bf16.msrb.mxu2 %v1134_v43  ;;  %885 = vmatpush.bf16.msrb.mxu3 %v1358_v47  ;;  %v1505_v25 = vld [vmem:[%s2443_s3 + $0x358] sm:$0xf]  ;;  %v1629_v26 = vld [vmem:[%s2443_s3 + $0x370] sm:$0xf0]  ;;  %v1626_v32 = vld [vmem:[%s2443_s3 + $0x35c] sm:$0xf]  ;;  %v1282_v37 = vor.u32 %v1573_v24, %v1281_v23 }
  0x3f   :  { %v1283_v31 = vld [vmem:[%s2443_s3 + $0x1b4] sm:$0xf0]  ;;  %v1506_v38 = vor.u32 %v1629_v26, %v1505_v25  ;;  %v1253_v39 = vld [vmem:[%s2443_s3 + $0x160] sm:$0xf]  ;;  %v1566_v40 = vld [vmem:[%s2443_s3 + $0x178] sm:$0xf0] }
  0x40   :  { %898 = vmatpush.bf16.msra.mxu0 %v1138_v51  ;;  %v1507_v33 = vld [vmem:[%s2443_s3 + $0x374] sm:$0xf0]  ;;  %v1286_v41 = vor.u32 %v1570_v27, %v1283_v31  ;;  %v1477_v43 = vld [vmem:[%s2443_s3 + $0x320] sm:$0xf]  ;;  %v1622_v44 = vld [vmem:[%s2443_s3 + $0x338] sm:$0xf0]  ;;  %v1254_v49 = vor.u32 %v1566_v40, %v1253_v39 }
  0x41   :  { %911 = vmatpush.bf16.msra.mxu1 %v1362_v52  ;;  %v1510_v42 = vor.u32 %v1626_v32, %v1507_v33  ;;  %v1563_v45 = vld [vmem:[%s2443_s3 + $0x164] sm:$0xf]  ;;  %v1255_v46 = vld [vmem:[%s2443_s3 + $0x17c] sm:$0xf0]  ;;  %v1478_v50 = vor.u32 %v1622_v44, %v1477_v43  ;;  %v1225_v51 = vld [vmem:[%s2443_s3 + $0x128] sm:$0xf] }
  0x42   :  { %873 = vmatpush.bf16.msrb.mxu2 %v1106_v56  ;;  %886 = vmatpush.bf16.msrb.mxu3 %v1330_v60  ;;  %v1619_v47 = vld [vmem:[%s2443_s3 + $0x324] sm:$0xf]  ;;  %v1479_v48 = vld [vmem:[%s2443_s3 + $0x33c] sm:$0xf0]  ;;  %v1258_v53 = vor.u32 %v1563_v45, %v1255_v46  ;;  %v1449_v55 = vld [vmem:[%s2443_s3 + $0x2e8] sm:$0xf] }
  0x43   :  { %v1559_v52 = vld [vmem:[%s2443_s3 + $0x140] sm:$0xf0]  ;;  %v1482_v54 = vor.u32 %v1619_v47, %v1479_v48  ;;  %v1556_v57 = vld [vmem:[%s2443_s3 + $0x12c] sm:$0xf]  ;;  %v1227_v58 = vld [vmem:[%s2443_s3 + $0x144] sm:$0xf0] }
  0x44   :  { %899 = vmatpush.bf16.msra.mxu0 %v1110_v61  ;;  %v1615_v56 = vld [vmem:[%s2443_s3 + $0x300] sm:$0xf0]  ;;  %v1612_v59 = vld [vmem:[%s2443_s3 + $0x2ec] sm:$0xf]  ;;  %v1451_v60 = vld [vmem:[%s2443_s3 + $0x304] sm:$0xf0]  ;;  %v1226_v61 = vor.u32 %v1559_v52, %v1225_v51  ;;  %v1230_v1 = vor.u32 %v1556_v57, %v1227_v58 }
  0x45   :  { %912 = vmatpush.bf16.msra.mxu1 %v1334_v0  ;;  %v1450_v62 = vor.u32 %v1615_v56, %v1449_v55  ;;  %v1197_v63 = vld [vmem:[%s2443_s3 + $0xf0] sm:$0xf]  ;;  %v1552_v0 = vld [vmem:[%s2443_s3 + $0x108] sm:$0xf0]  ;;  %v1454_v2 = vor.u32 %v1612_v59, %v1451_v60  ;;  %v1549_v5 = vld [vmem:[%s2443_s3 + $0xf4] sm:$0xf] }
  0x46   :  { %874 = vmatpush.bf16.msrb.mxu2 %v1078_v4  ;;  %887 = vmatpush.bf16.msrb.mxu3 %v1302_v6  ;;  %v1421_v3 = vld [vmem:[%s2443_s3 + $0x2b0] sm:$0xf]  ;;  %v1608_v4 = vld [vmem:[%s2443_s3 + $0x2c8] sm:$0xf0]  ;;  %v1605_v7 = vld [vmem:[%s2443_s3 + $0x2b4] sm:$0xf]  ;;  %v1198_v9 = vor.u32 %v1552_v0, %v1197_v63 }
  0x47   :  { %v1199_v6 = vld [vmem:[%s2443_s3 + $0x10c] sm:$0xf0]  ;;  %v1169_v11 = vld [vmem:[%s2443_s3 + $0xb8] sm:$0xf]  ;;  %v1141_v23 = vld [vmem:[%s2443_s3 + $0x80] sm:$0xf] }
  0x48   :  { %900 = vmatpush.bf16.msra.mxu0 %v1082_v10  ;;  %v1423_v8 = vld [vmem:[%s2443_s3 + $0x2cc] sm:$0xf0]  ;;  %v1422_v10 = vor.u32 %v1608_v4, %v1421_v3  ;;  %v1202_v13 = vor.u32 %v1549_v5, %v1199_v6  ;;  %v1538_v24 = vld [vmem:[%s2443_s3 + $0x98] sm:$0xf0]  ;;  %v1365_v27 = vld [vmem:[%s2443_s3 + $0x240] sm:$0xf] }
  0x49   :  { %913 = vmatpush.bf16.msra.mxu1 %v1306_v12  ;;  %v1545_v12 = vld [vmem:[%s2443_s3 + $0xd0] sm:$0xf0]  ;;  %v1591_v31 = vld [vmem:[%s2443_s3 + $0x244] sm:$0xf]  ;;  %v1367_v32 = vld [vmem:[%s2443_s3 + $0x25c] sm:$0xf0]  ;;  %v1142_v33 = vor.u32 %v1538_v24, %v1141_v23 }
  0x4a   :  { %v1370_v40 = vor.u32 %v1591_v31, %v1367_v32  ;;  %v1528_v43 = vld [vmem:[%s2443_s3 + $0x4c] sm:$0xf]  ;;  %v1115_v44 = vld [vmem:[%s2443_s3 + $0x64] sm:$0xf0]  ;;  %v1309_v51 = vld [vmem:[%s2443_s3 + $0x1d0] sm:$0xf] }
  0x4b   :  { %v1584_v45 = vld [vmem:[%s2443_s3 + $0x20c] sm:$0xf]  ;;  %v1339_v46 = vld [vmem:[%s2443_s3 + $0x224] sm:$0xf0]  ;;  %v1118_v52 = vor.u32 %v1528_v43, %v1115_v44  ;;  %v1521_v55 = vld [vmem:[%s2443_s3 + $0x14] sm:$0xf] }
  0x4c   :  { %v1087_v56 = vld [vmem:[%s2443_s3 + $0x2c] sm:$0xf0]  ;;  %v1577_v57 = vld [vmem:[%s2443_s3 + $0x1d4] sm:$0xf]  ;;  %v1289_v59 = vld [vmem:[%s2443_s3 + $0x1a0] sm:$0xf] }
  0x4d   :  { %v1311_v58 = vld [vmem:[%s2443_s3 + $0x1ec] sm:$0xf0]  ;;  %v1574_v60 = vld [vmem:[%s2443_s3 + $0x1b8] sm:$0xf0]  ;;  %v1261_v5 = vld [vmem:[%s2443_s3 + $0x168] sm:$0xf] }
  0x4e   :  { %v1290_v3 = vor.u32 %v1574_v60, %v1289_v59  ;;  %v1567_v6 = vld [vmem:[%s2443_s3 + $0x180] sm:$0xf0]  ;;  %v1177_v23 = vld [vmem:[%s2443_s3 + $0xc0] sm:$0xf]  ;;  %v1546_v24 = vld [vmem:[%s2443_s3 + $0xd8] sm:$0xf0] }
  0x4f   :  { %v1373_v31 = vld [vmem:[%s2443_s3 + $0x248] sm:$0xf]  ;;  %v1595_v32 = vld [vmem:[%s2443_s3 + $0x260] sm:$0xf0]  ;;  %v1093_v43 = vld [vmem:[%s2443_s3 + $0x18] sm:$0xf] }
  0x50   :  { %v1525_v44 = vld [vmem:[%s2443_s3 + $0x30] sm:$0xf0]  ;;  %s1040_s25 = sshll.u32 %s2445_s5, 4  ;;  %vm1031_vm1 = vcmask 130048   ;;  %s1041_s25 = int_to_ptr.hbm [resolvable:$true] %s1040_s25 }
  0x88   :  { %v66_v16 = vpop.f32.mrf.mxu0 }
  0x89   :  { %v67_v17 = vadd.f32 %v66_v16, %v29_v14  ;;  %v79_v18 = vpop.f32.mrf.mxu1  ;;  %v1426_v14 = vor.u32 %v1605_v7, %v1423_v8  ;;  %v1601_v16 = vld [vmem:[%s2443_s3 + $0x290] sm:$0xf0]  ;;  %v1485_v7 = vld [vmem:[%s2443_s3 + $0x328] sm:$0xf]  ;;  %v1623_v8 = vld [vmem:[%s2443_s3 + $0x340] sm:$0xf0] }
  0x8a   :  { %v80_v19 = vadd.f32 %v79_v18, %v30_v15  ;;  %v1393_v15 = vld [vmem:[%s2443_s3 + $0x278] sm:$0xf] }
  0x8b   :  { %v83_v20 = vmax.f32 %v67_v17, 0.0  ;;  %v1542_v17 = vld [vmem:[%s2443_s3 + $0xbc] sm:$0xf]  ;;  %v1171_v18 = vld [vmem:[%s2443_s3 + $0xd4] sm:$0xf0] }
  0x8c   :  { %v84_v21 = vmax.f32 %v80_v19, 0.0  ;;  %v1598_v19 = vld [vmem:[%s2443_s3 + $0x27c] sm:$0xf]  ;;  %v1174_v25 = vor.u32 %v1542_v17, %v1171_v18  ;;  %v1205_v17 = vld [vmem:[%s2443_s3 + $0xf8] sm:$0xf] }
  0x8d   :  { %v1553_v18 = vld [vmem:[%s2443_s3 + $0x110] sm:$0xf0] }
  0x8e   :  { %v85_v22 = vpack.c.bf16 %v84_v21, %v83_v20  ;;  %v1395_v20 = vld [vmem:[%s2443_s3 + $0x294] sm:$0xf0]  ;;  %v1170_v21 = vor.u32 %v1545_v12, %v1169_v11  ;;  %v1233_v11 = vld [vmem:[%s2443_s3 + $0x130] sm:$0xf]  ;;  %v1560_v12 = vld [vmem:[%s2443_s3 + $0x148] sm:$0xf0] }
  0x8f   :  { %v1398_v26 = vor.u32 %v1598_v19, %v1395_v20  ;;  %v1429_v19 = vld [vmem:[%s2443_s3 + $0x2b8] sm:$0xf]  ;;  %v1609_v20 = vld [vmem:[%s2443_s3 + $0x2d0] sm:$0xf0] }
  0x90   :  { %v233_v28 = vunpack.c.l.b16 %v85_v22  ;;  %v234_v29 = vunpack.c.h.b16 %v85_v22  ;;  %v68_v30 = vpop.f32.mrf.mxu0  ;;  %v1394_v22 = vor.u32 %v1601_v16, %v1393_v15  ;;  %v1234_v15 = vor.u32 %v1560_v12, %v1233_v11 }
  0x91   :  { %v81_v34 = vpop.f32.mrf.mxu1  ;;  %v1143_v30 = vld [vmem:[%s2443_s3 + $0x9c] sm:$0xf0] }
  0x92   :  { %v2143_v35 = vpack.c.b16 %v233_v28, %v233_v28  ;;  %v2145_v36 = vpack.c.b16 %v234_v29, %v234_v29  ;;  %v1594_v28 = vld [vmem:[%s2443_s3 + $0x258] sm:$0xf0]  ;;  %v1535_v29 = vld [vmem:[%s2443_s3 + $0x84] sm:$0xf] }
  0x93   :  { %v1366_v34 = vor.u32 %v1594_v28, %v1365_v27  ;;  %v1146_v39 = vor.u32 %v1535_v29, %v1143_v30  ;;  %v1178_v27 = vor.u32 %v1546_v24, %v1177_v23  ;;  %v1149_v29 = vld [vmem:[%s2443_s3 + $0x88] sm:$0xf]  ;;  %v1539_v30 = vld [vmem:[%s2443_s3 + $0xa0] sm:$0xf0] }
  0x94   :  { %823 = vmatmul.bf16.vlgmr.msra.gmra.mxu2 %v2143_v35  ;;  %836 = vmatmul.bf16.vlgmr.msra.gmra.mxu3 %v2145_v36 }
  0x95   :  { %849 = vmatmul.bf16.vlgmr.msrb.gmra.mxu0 %v2143_v35  ;;  %862 = vmatmul.bf16.vlgmr.msrb.gmra.mxu1 %v2145_v36 }
  0x96   :  { %919 = vmatpush.bf16.msra.mxu2 %v1282_v37  ;;  %932 = vmatpush.bf16.msra.mxu3 %v1506_v38  ;;  %v1113_v37 = vld [vmem:[%s2443_s3 + $0x48] sm:$0xf]  ;;  %v1531_v38 = vld [vmem:[%s2443_s3 + $0x60] sm:$0xf0] }
  0x97   :  { %945 = vmatpush.bf16.msrb.mxu0 %v1286_v41  ;;  %958 = vmatpush.bf16.msrb.mxu1 %v1510_v42  ;;  %v1337_v41 = vld [vmem:[%s2443_s3 + $0x208] sm:$0xf]  ;;  %v1587_v42 = vld [vmem:[%s2443_s3 + $0x220] sm:$0xf0]  ;;  %v1114_v47 = vor.u32 %v1531_v38, %v1113_v37  ;;  %v1121_v37 = vld [vmem:[%s2443_s3 + $0x50] sm:$0xf] }
  0x98   :  { %v1338_v48 = vor.u32 %v1587_v42, %v1337_v41  ;;  %v1532_v38 = vld [vmem:[%s2443_s3 + $0x68] sm:$0xf0] }
  0x99   :  { %v1122_v41 = vor.u32 %v1532_v38, %v1121_v37 }
  0x9a   :  { %920 = vmatpush.bf16.msra.mxu2 %v1254_v49  ;;  %933 = vmatpush.bf16.msra.mxu3 %v1478_v50  ;;  %v1085_v49 = vld [vmem:[%s2443_s3 + $0x10] sm:$0xf]  ;;  %v1524_v50 = vld [vmem:[%s2443_s3 + $0x28] sm:$0xf0] }
  0x9b   :  { %946 = vmatpush.bf16.msrb.mxu0 %v1258_v53  ;;  %959 = vmatpush.bf16.msrb.mxu1 %v1482_v54  ;;  %v1342_v53 = vor.u32 %v1584_v45, %v1339_v46  ;;  %v1580_v54 = vld [vmem:[%s2443_s3 + $0x1e8] sm:$0xf0]  ;;  %v1086_v63 = vor.u32 %v1524_v50, %v1085_v49  ;;  %v1317_v45 = vld [vmem:[%s2443_s3 + $0x1d8] sm:$0xf]  ;;  %v1581_v46 = vld [vmem:[%s2443_s3 + $0x1f0] sm:$0xf0] }
  0x9c   :  { %v1310_v0 = vor.u32 %v1580_v54, %v1309_v51  ;;  %v2428_v49 = vld [vmem:[%s2444_s4] sm:$0x7f] }
  0x9d   :  { %v219_v50 = vperm.slane %v2428_v49, 1  ;;  %v218_v54 = vperm.slane %v2428_v49, 0  ;;  %v223_v24 = vperm.slane %v2428_v49, 5 }
  0x9e   :  { %921 = vmatpush.bf16.msra.mxu2 %v1226_v61  ;;  %934 = vmatpush.bf16.msra.mxu3 %v1450_v62  ;;  %v1513_v61 = vld [vmem:[%s2443_s3 + $0x360] sm:$0xf]  ;;  %v1630_v62 = vld [vmem:[%s2443_s3 + $0x378] sm:$0xf0] }
  0x9f   :  { %947 = vmatpush.bf16.msrb.mxu0 %v1230_v1  ;;  %960 = vmatpush.bf16.msrb.mxu1 %v1454_v2  ;;  %v1090_v1 = vor.u32 %v1521_v55, %v1087_v56  ;;  %v1314_v2 = vor.u32 %v1577_v57, %v1311_v58  ;;  %v1514_v4 = vor.u32 %v1630_v62, %v1513_v61 }
  0xa2   :  { %922 = vmatpush.bf16.msra.mxu2 %v1198_v9  ;;  %935 = vmatpush.bf16.msra.mxu3 %v1422_v10  ;;  %v1262_v9 = vor.u32 %v1567_v6, %v1261_v5  ;;  %v1486_v10 = vor.u32 %v1623_v8, %v1485_v7  ;;  %v220_v8 = vperm.slane %v2428_v49, 2 }
  0xa3   :  { %948 = vmatpush.bf16.msrb.mxu0 %v1202_v13  ;;  %961 = vmatpush.bf16.msrb.mxu1 %v1426_v14  ;;  %v1457_v13 = vld [vmem:[%s2443_s3 + $0x2f0] sm:$0xf]  ;;  %v1616_v14 = vld [vmem:[%s2443_s3 + $0x308] sm:$0xf0] }
  0xa4   :  { %875 = vmatmul.bf16.vlgmr.msrb.gmra.mxu2 %v2143_v35  ;;  %888 = vmatmul.bf16.vlgmr.msrb.gmra.mxu3 %v2145_v36  ;;  %v1458_v16 = vor.u32 %v1616_v14, %v1457_v13 }
  0xa5   :  { %901 = vmatmul.bf16.vlgmr.msra.gmra.mxu0 %v2143_v35  ;;  %914 = vmatmul.bf16.vlgmr.msra.gmra.mxu1 %v2145_v36 }
  0xa6   :  { %923 = vmatpush.bf16.msra.mxu2 %v1170_v21  ;;  %936 = vmatpush.bf16.msra.mxu3 %v1394_v22  ;;  %v1206_v21 = vor.u32 %v1553_v18, %v1205_v17  ;;  %v1430_v22 = vor.u32 %v1609_v20, %v1429_v19 }
  0xa7   :  { %949 = vmatpush.bf16.msrb.mxu0 %v1174_v25  ;;  %962 = vmatpush.bf16.msrb.mxu1 %v1398_v26  ;;  %v1401_v25 = vld [vmem:[%s2443_s3 + $0x280] sm:$0xf]  ;;  %v1602_v26 = vld [vmem:[%s2443_s3 + $0x298] sm:$0xf0] }
  0xa8   :  { %v1402_v28 = vor.u32 %v1602_v26, %v1401_v25 }
  0xaa   :  { %924 = vmatpush.bf16.msra.mxu2 %v1142_v33  ;;  %937 = vmatpush.bf16.msra.mxu3 %v1366_v34  ;;  %v1150_v33 = vor.u32 %v1539_v30, %v1149_v29  ;;  %v1374_v34 = vor.u32 %v1595_v32, %v1373_v31  ;;  %v222_v31 = vperm.slane %v2428_v49, 4 }
  0xab   :  { %950 = vmatpush.bf16.msrb.mxu0 %v1146_v39  ;;  %963 = vmatpush.bf16.msrb.mxu1 %v1370_v40  ;;  %v1345_v39 = vld [vmem:[%s2443_s3 + $0x210] sm:$0xf]  ;;  %v1588_v40 = vld [vmem:[%s2443_s3 + $0x228] sm:$0xf0]  ;;  %s1672_s3 = smov [#allocation3]  }
  0xac   :  { %v1346_v42 = vor.u32 %v1588_v40, %v1345_v39  ;;  %s1038_s4 = sshll.u32 %s1672_s3, 4  ;;  %s1039_s4 = int_to_ptr.vmem [resolvable:$true] %s1038_s4 }
  0xae   :  { %925 = vmatpush.bf16.msra.mxu2 %v1114_v47  ;;  %938 = vmatpush.bf16.msra.mxu3 %v1338_v48  ;;  %v1094_v47 = vor.u32 %v1525_v44, %v1093_v43  ;;  %v1318_v48 = vor.u32 %v1581_v46, %v1317_v45 }
  0xaf   :  { %951 = vmatpush.bf16.msrb.mxu0 %v1118_v52  ;;  %964 = vmatpush.bf16.msrb.mxu1 %v1342_v53 }
  0xb2   :  { %926 = vmatpush.bf16.msra.mxu2 %v1086_v63  ;;  %939 = vmatpush.bf16.msra.mxu3 %v1310_v0 }
  0xb3   :  { %952 = vmatpush.bf16.msrb.mxu0 %v1090_v1  ;;  %965 = vmatpush.bf16.msrb.mxu1 %v1314_v2  ;;  %v221_v1 = vperm.slane %v2428_v49, 3 }
  0xb5   :  { %927 = vmatmul.bf16.vlgmr.msra.gmra.mxu2 %v2143_v35  ;;  %940 = vmatmul.bf16.vlgmr.msra.gmra.mxu3 %v2145_v36 }
  0xb6   :  { %971 = vmatpush.bf16.msrb.mxu2 %v1290_v3  ;;  %984 = vmatpush.bf16.msrb.mxu3 %v1514_v4 }
  0xb7   :  { %953 = vmatmul.bf16.vlgmr.msrb.gmra.mxu0 %v2143_v35  ;;  %966 = vmatmul.bf16.vlgmr.msrb.gmra.mxu1 %v2145_v36 }
  0xba   :  { %972 = vmatpush.bf16.msrb.mxu2 %v1262_v9  ;;  %985 = vmatpush.bf16.msrb.mxu3 %v1486_v10 }
  0xbe   :  { %973 = vmatpush.bf16.msrb.mxu2 %v1234_v15  ;;  %986 = vmatpush.bf16.msrb.mxu3 %v1458_v16 }
  0xc2   :  { %974 = vmatpush.bf16.msrb.mxu2 %v1206_v21  ;;  %987 = vmatpush.bf16.msrb.mxu3 %v1430_v22 }
  0xc6   :  { %975 = vmatpush.bf16.msrb.mxu2 %v1178_v27  ;;  %988 = vmatpush.bf16.msrb.mxu3 %v1402_v28 }
  0xca   :  { %976 = vmatpush.bf16.msrb.mxu2 %v1150_v33  ;;  %989 = vmatpush.bf16.msrb.mxu3 %v1374_v34 }
  0xce   :  { %977 = vmatpush.bf16.msrb.mxu2 %v1122_v41  ;;  %990 = vmatpush.bf16.msrb.mxu3 %v1346_v42 }
  0xd2   :  { %978 = vmatpush.bf16.msrb.mxu2 %v1094_v47  ;;  %991 = vmatpush.bf16.msrb.mxu3 %v1318_v48 }
  0xd5   :  { %979 = vmatmul.bf16.vlgmr.msrb.gmra.mxu2 %v2143_v35  ;;  %992 = vmatmul.bf16.vlgmr.msrb.gmra.mxu3 %v2145_v36 }
 0x112   :  { %v850_v51 = vpop.f32.mrf.mxu0  ;;  %v863_v52 = vpop.f32.mrf.mxu1 }
 0x113   :  { %v851_v53 = vadd.f32 %v850_v51, %v219_v50 }
 0x115   :  { %v864_v55 = vadd.f32 %v863_v52, %v851_v53  ;;  %v224_v53 = vperm.slane %v2428_v49, 6 }
 0x117   :  { %v998_v56 = vmul.f32 0.5, %v864_v55  ;;  %v824_v57 = vpop.f32.mrf.mxu2  ;;  %v837_v58 = vpop.f32.mrf.mxu3 }
 0x118   :  { %v825_v59 = vadd.f32 %v824_v57, %v218_v54 }
 0x119   :  { %1632 = vtanh.f32 %v998_v56 }
 0x11a   :  { %v838_v35 = vadd.f32 %v837_v58, %v825_v59  ;;  %v852_v36 = vpop.f32.mrf.mxu0  ;;  %v865_v60 = vpop.f32.mrf.mxu1 }
 0x11c   :  { %v997_v61 = vmul.f32 0.5, %v838_v35 }
 0x11e   :  { %1634 = vtanh.f32 %v997_v61 }
 0x11f   :  { %v1633_v62 = vpop.eup %1632  ;;  %v826_v63 = vpop.f32.mrf.mxu2 }
 0x120   :  { %v839_v0 = vpop.f32.mrf.mxu3  ;;  %v1012_v2 = vadd.f32 1.0, %v1633_v62 }
 0x122   :  { %v1019_v3 = vmul.f32 0.5, %v1012_v2  ;;  %v902_v4 = vpop.f32.mrf.mxu0  ;;  %v915_v5 = vpop.f32.mrf.mxu1 }
 0x123   :  { %v903_v6 = vadd.f32 %v902_v4, %v221_v1 }
 0x124   :  { %v1635_v7 = vpop.eup %1634  ;;  %1026 = vst [vmem:[#allocation3 + $0x8] sm:$0xff] %v1019_v3 }
 0x125   :  { %v1011_v9 = vadd.f32 1.0, %v1635_v7  ;;  %v916_v10 = vadd.f32 %v915_v5, %v903_v6 }
 0x127   :  { %v1018_v11 = vmul.f32 0.5, %v1011_v9  ;;  %v1000_v12 = vmul.f32 0.5, %v916_v10  ;;  %v876_v13 = vpop.f32.mrf.mxu2 }
 0x128   :  { %v889_v14 = vpop.f32.mrf.mxu3  ;;  %v877_v15 = vadd.f32 %v876_v13, %v220_v8 }
 0x129   :  { %1025 = vst [vmem:[#allocation3] sm:$0xff] %v1018_v11  ;;  %1636 = vtanh.f32 %v1000_v12 }
 0x12a   :  { %v890_v16 = vadd.f32 %v889_v14, %v877_v15  ;;  %v904_v17 = vpop.f32.mrf.mxu0  ;;  %v917_v18 = vpop.f32.mrf.mxu1 }
 0x12c   :  { %v999_v19 = vmul.f32 0.5, %v890_v16 }
 0x12e   :  { %1638 = vtanh.f32 %v999_v19 }
 0x12f   :  { %v1637_v20 = vpop.eup %1636  ;;  %v878_v21 = vpop.f32.mrf.mxu2 }
 0x130   :  { %v891_v22 = vpop.f32.mrf.mxu3  ;;  %v1014_v23 = vadd.f32 1.0, %v1637_v20 }
 0x132   :  { %v1021_v25 = vmul.f32 0.5, %v1014_v23 }
 0x134   :  { %v954_v26 = vpop.f32.mrf.mxu0  ;;  %v967_v27 = vpop.f32.mrf.mxu1  ;;  %1028 = vst [vmem:[#allocation3 + $0x18] sm:$0xff] %v1021_v25 }
 0x135   :  { %v1639_v28 = vpop.eup %1638  ;;  %v955_v29 = vadd.f32 %v954_v26, %v223_v24 }
 0x136   :  { %v1013_v30 = vadd.f32 1.0, %v1639_v28 }
 0x137   :  { %v968_v32 = vadd.f32 %v967_v27, %v955_v29 }
 0x138   :  { %v1020_v33 = vmul.f32 0.5, %v1013_v30  ;;  %v928_v37 = vpop.f32.mrf.mxu2  ;;  %v941_v38 = vpop.f32.mrf.mxu3 }
 0x139   :  { %v1002_v34 = vmul.f32 0.5, %v968_v32  ;;  %v929_v39 = vadd.f32 %v928_v37, %v222_v31 }
 0x13a   :  { %1027 = vst [vmem:[#allocation3 + $0x10] sm:$0xff] %v1020_v33 }
 0x13b   :  { %1640 = vtanh.f32 %v1002_v34  ;;  %v942_v40 = vadd.f32 %v941_v38, %v929_v39 }
 0x13c   :  { %v956_v41 = vpop.f32.mrf.mxu0  ;;  %v969_v42 = vpop.f32.mrf.mxu1 }
 0x13d   :  { %v1001_v43 = vmul.f32 0.5, %v942_v40 }
 0x13f   :  { %1642 = vtanh.f32 %v1001_v43 }
 0x140   :  { %v930_v45 = vpop.f32.mrf.mxu2  ;;  %v943_v46 = vpop.f32.mrf.mxu3 }
 0x141   :  { %v1641_v44 = vpop.eup %1640 }
 0x142   :  { %v1016_v47 = vadd.f32 1.0, %v1641_v44 }
 0x144   :  { %v1023_v48 = vmul.f32 0.5, %v1016_v47 }
 0x145   :  { %v1643_v50 = vpop.eup %1642 }
 0x146   :  { %1030 = vst [vmem:[#allocation3 + $0x28] sm:$0xff] %v1023_v48  ;;  %v1015_v51 = vadd.f32 1.0, %v1643_v50 }
 0x148   :  { %v1022_v52 = vmul.f32 0.5, %v1015_v51 }
 0x14a   :  { %1029 = vst [vmem:[#allocation3 + $0x20] sm:$0xff] %v1022_v52 }
 0x158   :  { %v980_v54 = vpop.f32.mrf.mxu2  ;;  %v993_v55 = vpop.f32.mrf.mxu3 }
 0x159   :  { %v981_v56 = vadd.f32 %v980_v54, %v224_v53 }
 0x15b   :  { %v994_v57 = vadd.f32 %v993_v55, %v981_v56 }
 0x15d   :  { %v1003_v58 = vmul.f32 0.5, %v994_v57 }
 0x15f   :  { %1644 = vtanh.f32 %v1003_v58 }
 0x160   :  { %v982_v59 = vpop.f32.mrf.mxu2  ;;  %v995_v35 = vpop.f32.mrf.mxu3 }
 0x165   :  { %v1645_v36 = vpop.eup %1644 }
 0x166   :  { %v1017_v60 = vadd.f32 1.0, %v1645_v36 }
 0x168   :  { %v1024_v61 = vmul.f32 0.5, %v1017_v60 }
 0x16a   :  { %1032 = vst.msk [vmem:[#allocation3 + $0x30] sm:$0xff] %vm1031_vm1, %v1024_v61 }
 0x16b   :  { %1043 = dma.vmem_to_hbm [thread:$0]  %s1039_s4, 896, %s1041_s25, [#allocation4]  }
 0x16c   :  { %1670 = dma.done.wait [#allocation4], 896  }
 0x16d   :  { %1671 = vsyncadd [#allocation4], 4294966400 }
 0x16e   :  { %1048 = vsyncpa [#allocation4], 1 }

</bundles_post_ra>
